<compile_context>
chip_gen: v6e
topology: v6e:2x2x1
jax: 0.10.0
libtpu: 0.0.40
codegen_flags: <defaults>
</compile_context>

<pallas_src>
import jax
import jax.numpy as jnp
from jax.experimental import pallas as pl
from jax.experimental.pallas import tpu as pltpu


def _pair_max_kernel(x_ref, o_ref):
    # x_ref: (T, 2C) row tile; o_ref: (T, C)
    c = o_ref.shape[-1]
    # The two halves are lane-aligned vreg slices (C a full-dim block), so this
    # lowers to one VPU vmaximum per output vreg with zero layout work.
    o_ref[...] = jnp.maximum(x_ref[:, :c], x_ref[:, c:])


def _pick_row_tile(rows, c, itemsize):
    """Largest row tile (<=2048, dtype-aware sublane multiple) whose
    double-buffered in(2C)+out(C) footprint stays under ~12 MiB so it fits the
    scoped-VMEM default on every TPU generation (v5e 16 MiB / v6e 32 MiB /
    v7x 32 of 64 MiB)."""
    mult = max(8, 32 // max(1, itemsize))        # 8 f32, 16 bf16, 32 int8
    budget = 12 * 1024 * 1024                    # bytes
    t = budget // (6 * c * itemsize)             # 2*(2C + C)*T*itemsize <= budget
    t = max(mult, min(int(t), 2048))
    t -= t % mult
    return rows if t >= rows else t


def graclus_max_pool(x_s, num_graphs, *, use_pallas=None):
    """x_s: (num_graphs * N, C) -> pooled (num_graphs * N//2, C)."""
    total_nodes, c = x_s.shape
    n = total_nodes // num_graphs
    assert n % 2 == 0, "node count per graph must be even for MaxPool1d(2,2)"
    rows = total_nodes // 2

    # Pairing never crosses a graph boundary (N is even), so the batch can be
    # flattened: each output row depends only on its own 2C-wide input row.
    xf = x_s.reshape(rows, 2 * c)                # free: identical HBM layout

    if use_pallas is None:
        # For tiny problems a custom call is pure overhead -> plain XLA.
        use_pallas = xf.size * xf.dtype.itemsize >= (1 << 20)
    if not use_pallas:
        return jnp.maximum(xf[:, :c], xf[:, c:])

    t = _pick_row_tile(rows, c, xf.dtype.itemsize)
    grid = (pl.cdiv(rows, t),)

    pooled = pl.pallas_call(
        _pair_max_kernel,
        out_shape=jax.ShapeDtypeStruct((rows, c), x_s.dtype),
        grid_spec=pltpu.PrefetchScalarGridSpec(
            num_scalar_prefetch=0,
            grid=grid,
            in_specs=[pl.BlockSpec((t, 2 * c), lambda i: (i, 0))],
            out_specs=pl.BlockSpec((t, c), lambda i: (i, 0)),
        ),
        compiler_params=pltpu.CompilerParams(
            dimension_semantics=("parallel",),
            vmem_limit_bytes=32 * 1024 * 1024),
    )(xf)

    # Batch.from_data_list: concatenate per-graph pooled node features.
    return pooled


def graclus_pooling_forward(x_s, num_graphs, s_batch,
                            edge_index_s1, edge_weight_s1, *, use_pallas=None):
    """Full forward: returns (new_x_s, new_edge_index_s, new_edge_weight_s,
    new_s_batch).  Graph re-batching (edge offsets / concatenation) is glue
    done in plain JAX; the pooling hot path runs in the Pallas kernel."""
    new_x = graclus_max_pool(x_s, num_graphs, use_pallas=use_pallas)
    n_half = new_x.shape[0] // num_graphs

    # Batch.from_data_list on edges: replicate edge_index with node offsets,
    # tile edge weights.
    num_edges = edge_index_s1.shape[1]
    offsets = jnp.arange(num_graphs, dtype=edge_index_s1.dtype) * n_half
    new_edge_index = (edge_index_s1[:, None, :] + offsets[None, :, None]
                      ).reshape(2, num_graphs * num_edges)
    new_edge_weight = jnp.tile(edge_weight_s1, (num_graphs,))

    new_s_batch = s_batch[::2]
    return new_x, new_edge_index, new_edge_weight, new_s_batch


if __name__ == "__main__":
    key = jax.random.PRNGKey(0)
    k1, k2, k3 = jax.random.split(key, 3)

    num_graphs = 2          # batch of graphs
    n_nodes = 16            # nodes per graph (even)
    channels = 128          # feature dim (lane-aligned)

    x_s = jax.random.normal(k1, (num_graphs * n_nodes, channels),
                            dtype=jnp.float32)
    # superior-level graph topology (shared by all graphs after pooling)
    num_edges_s1 = 12
    edge_index_s1 = jax.random.randint(
        k2, (2, num_edges_s1), 0, n_nodes // 2, dtype=jnp.int32)
    edge_weight_s1 = jax.random.uniform(k3, (num_edges_s1,),
                                        dtype=jnp.float32)
    # s_batch: graph-assignment vector over superior-level nodes
    s_batch = jnp.repeat(jnp.arange(num_graphs, dtype=jnp.int32), n_nodes)

    # Force the Pallas path even at this tiny demo size so the kernel runs.
    new_x, new_ei, new_ew, new_sb = jax.block_until_ready(
        graclus_pooling_forward(x_s, num_graphs, s_batch,
                                edge_index_s1, edge_weight_s1,
                                use_pallas=True))

    # reference check (pure JAX, mirrors the PyTorch MaxPool1d(2,2) semantics)
    xr = x_s.reshape(num_graphs, n_nodes, channels)        # (B, N, C)
    xr = jnp.transpose(xr, (0, 2, 1))                      # (B, C, N)
    xr = jnp.max(xr.reshape(num_graphs, channels, n_nodes // 2, 2), axis=-1)
    xr = jnp.transpose(xr, (0, 2, 1)).reshape(-1, channels)
    assert new_x.shape == (num_graphs * n_nodes // 2, channels)
    assert jnp.allclose(new_x, xr)

    # XLA fallback path must agree as well.
    new_x_fallback = graclus_max_pool(x_s, num_graphs, use_pallas=False)
    assert jnp.allclose(new_x_fallback, xr)

    assert new_sb.shape[0] == s_batch.shape[0] // 2
    assert new_ei.shape == (2, num_graphs * num_edges_s1)
    assert new_ew.shape == (num_graphs * num_edges_s1,)

    print("KERNEL_OK")
</pallas_src>

<mosaic_0001>
module attributes {stable_mosaic.version = 11 : i64} {
  func.func @_pair_max_kernel(%arg0: i32, %arg1: memref<16x256xf32, #tpu.memory_space<vmem>>, %arg2: memref<16x128xf32, #tpu.memory_space<vmem>>) attributes {dimension_semantics = [#tpu.dimension_semantics<parallel>], iteration_bounds = array<i64: 1>, scalar_prefetch = 0 : i64, scratch_operands = 0 : i64, tpu.core_type = #tpu.core_type<tc>, window_params = [{transform_indices = @transform_0, window_bounds = array<i64: 16, 256>}, {transform_indices = @transform_1, window_bounds = array<i64: 16, 128>}]} {
    %c0 = arith.constant 0 : index
    %c0_0 = arith.constant 0 : index
    %0 = vector.load %arg1[%c0, %c0_0] : memref<16x256xf32, #tpu.memory_space<vmem>>, vector<16x128xf32>
    %c0_1 = arith.constant 0 : index
    %c128 = arith.constant 128 : index
    %1 = vector.load %arg1[%c0_1, %c128] : memref<16x256xf32, #tpu.memory_space<vmem>>, vector<16x128xf32>
    %2 = arith.maximumf %0, %1 : vector<16x128xf32>
    %c0_2 = arith.constant 0 : index
    %c0_3 = arith.constant 0 : index
    %3 = vector.load %arg2[%c0_2, %c0_3] : memref<16x128xf32, #tpu.memory_space<vmem>>, vector<16x128xf32>
    tpu.vector_store %arg2[%c0_2, %c0_3], %2 {strides = array<i32>} : memref<16x128xf32, #tpu.memory_space<vmem>>, vector<16x128xf32>,
    return
  }
  func.func @transform_0(%arg0: i32) -> (i32, i32) {
    %c0_i32 = arith.constant 0 : i32
    %c0_i32_0 = arith.constant 0 : i32
    return %arg0, %c0_i32 : i32, i32
  }
  func.func @transform_1(%arg0: i32) -> (i32, i32) {
    %c0_i32 = arith.constant 0 : i32
    %c0_i32_0 = arith.constant 0 : i32
    return %arg0, %c0_i32 : i32, i32
  }
}

</mosaic_0001>

<bundles_post_ra>
// kernel: tpu_custom_call.1
= control target key start
LH: loop header
LB: loop body
LE: loop exit
PB: predicated region body
PF: predicated region fallthrough
CT: control target
= control target key end

     0   :  { %6 = vsyncpa [#allocation3], 0  ;;  %s120_s0 = inlined_call_operand.hbm [shape: f32[16,256], index: 0, kind: input, shape index: {}]   ;;  %s121_s1 = inlined_call_operand.hbm [shape: f32[16,128], index: 1, kind: output, shape index: {}]  }
   0x1   :  { %7 = vsyncpa [#allocation4], 0  ;;  %s98_s6 = smov [#allocation2]  }
   0x2   :  { %s13_s7 = sshll.u32 %s98_s6, 4  ;;  %s14_s7 = int_to_ptr.vmem [resolvable:$true] %s13_s7 }
   0x3   :  { %s62_s8 = scalar_lea.vmem %s14_s7, 512  ;;  %p67_p1 = scmp.lt.s32.totalorder %s14_s7, %s14_s7 }
   0x4   :  { %p63_p0 = scmp.ne.s32.totalorder %s14_s7, %s62_s8  ;;  %p68_p2 = scmp.lt.s32.totalorder %s62_s8, %s62_s8 }
   0x6   :  { %p69_p3 = por %p68_p2, %p67_p1 }
   0x8   :  { %p70_p4 = pnand %p69_p3, %p63_p0 }
   0xa   :  { %73 = shalt.err (!%p70_p4)
}
   0xb   :  { %s99_s9 = smov 256   ;;  %s100_s10 = smov 16  }
   0xc   :  { %19 = dma.hbm_to_vmem [thread:$0]  %s120_s0, 512, %s14_s7, [#allocation3], %s99_s9, %s99_s9, %s100_s10  }
   0xd   :  { %94 = dma.done.wait [#allocation3], 512  }
   0xe   :  { %95 = vsyncadd [#allocation3], 4294966784  ;;  %s101_s13 = smov [#allocation5]   ;;  %v23_v0 = vld [vmem:[#allocation2] sm:$0xff]  ;;  %v25_v1 = vld [vmem:[#allocation2 + $0x8] sm:$0xff] }
   0xf   :  { %s36_s14 = sshll.u32 %s101_s13, 4  ;;  %v24_v2 = vld [vmem:[#allocation2 + $0x10] sm:$0xff]  ;;  %v27_v3 = vmax.f32 %v23_v0, %v25_v1  ;;  %v26_v4 = vld [vmem:[#allocation2 + $0x18] sm:$0xff]  ;;  %s37_s14 = int_to_ptr.vmem [resolvable:$true] %s36_s14 }
  0x10   :  { %v28_v5 = vmax.f32 %v24_v2, %v26_v4  ;;  %s74_s15 = scalar_lea.vmem %s37_s14, 256  ;;  %p79_p6 = scmp.lt.s32.totalorder %s37_s14, %s37_s14 }
  0x11   :  { %29 = vst [vmem:[#allocation5] sm:$0xff] %v27_v3  ;;  %p75_p5 = scmp.ne.s32.totalorder %s37_s14, %s74_s15  ;;  %p80_p7 = scmp.lt.s32.totalorder %s74_s15, %s74_s15 }
  0x12   :  { %30 = vst [vmem:[#allocation5 + $0x8] sm:$0xff] %v28_v5 }
  0x13   :  { %p81_p8 = por %p80_p7, %p79_p6 }
  0x15   :  { %p82_p9 = pnand %p81_p8, %p75_p5 }
  0x17   :  { %85 = shalt.err (!%p82_p9)
}
  0x18   :  { %s102_s0 = smov 128   ;;  %s103_s16 = smov 8  }
  0x19   :  { %42 = dma.vmem_to_hbm [thread:$0]  %s37_s14, 256, %s121_s1, [#allocation4], %s102_s0, %s102_s0, %s103_s16  }
  0x1a   :  { %96 = dma.done.wait [#allocation4], 256  }
  0x1b   :  { %97 = vsyncadd [#allocation4], 4294967040 }
  0x1c   :  { %46 = vsyncpa [#allocation3], 1 }
  0x1d   :  { %47 = vsyncpa [#allocation4], 1 }

</bundles_post_ra>
